<compile_context>
chip_gen: v5e
topology: v5e:2x2
jax: 0.10.0
libtpu: 0.0.40
codegen_flags: <defaults>
</compile_context>

<pallas_src>
import jax
import jax.numpy as jnp
from jax import lax
from jax.experimental import pallas as pl
from jax.experimental.pallas import tpu as pltpu


def _round_up(x, m):
    return ((x + m - 1) // m) * m


# --------------------------------------------------------------------------------------
# Fast path: embedding table resident in VMEM, gather = dynamic in-VMEM row loads.
# --------------------------------------------------------------------------------------
def _make_resident_kernel(S, TB, Ep, inner_unroll):
    inv_s = 1.0 / float(S)

    def kernel(ids_ref,   # SMEM (Bp, S)  int32  token ids (pad rows hold pad_id)
               tbl_ref,   # VMEM (Vp, Ep) f32    embedding table (row V.. = zeros)
               w_ref,     # VMEM (Ep, Cp) f32    fc weight^T, zero-padded
               b_ref,     # VMEM (1, Cp)  f32    fc bias, zero-padded
               out_ref,   # VMEM (TB, Cp) f32    logits for this batch tile
               acc_ref):  # VMEM (TB, Ep) f32    pooled-sum scratch
        bi = pl.program_id(0)

        # Per-row pooled sum. Padded batch rows hold pad_id, which maps to an all-zero
        # table row, so no gating is needed and the result is sliced off by the wrapper.
        @pl.loop(0, TB)
        def _(p):
            row = bi * TB + p

            def body(s, acc):
                tok = ids_ref[row, s]                      # scalar read from SMEM
                return acc + tbl_ref[pl.ds(tok, 1), :]     # dynamic VMEM row load

            acc = lax.fori_loop(0, S, body,
                                jnp.zeros((1, Ep), jnp.float32),
                                unroll=inner_unroll)
            acc_ref[pl.ds(p, 1), :] = acc

        # Finalize once per batch tile: mean scale, MXU matmul, bias, lane-dense store.
        pooled = acc_ref[...] * inv_s
        out_ref[...] = (jnp.dot(pooled, w_ref[...],
                                preferred_element_type=jnp.float32)
                        + b_ref[...])

    return kernel


# --------------------------------------------------------------------------------------
# General path: table stays in HBM; double-buffered per-row gather DMAs.
# --------------------------------------------------------------------------------------
def _make_gather_kernel(S, TB, TS, n_seq_tiles):
    inv_s = 1.0 / float(S)

    def kernel(ids_ref,   # SMEM (Bp, Sp) int32  token ids (pad rows/cols hold pad_id)
               emb_hbm,   # ANY  (Vp, Ep) f32    embedding table, stays in HBM
               w_ref,     # VMEM (Ep, Cp) f32    fc weight^T, zero-padded
               b_ref,     # VMEM (1, Cp)  f32    fc bias, zero-padded
               out_ref,   # VMEM (TB, Cp) f32    logits for this batch tile
               row_buf,   # VMEM (2, TB, TS, Ep) f32  double-buffered gathered rows
               sem,       # DMA semaphores (2,)  -- ONE per buffer slot (review #1)
               acc_ref):  # VMEM (TB, Ep) f32    pooled-sum scratch
        bi = pl.program_id(0)

        def issue(tile, slot):
            # Nested loops: no integer div/mod on the scalar unit (review #2).
            base = tile * TS

            @pl.loop(0, TB)
            def _(p):
                row = bi * TB + p

                @pl.loop(0, TS)
                def _(q):
                    tok = ids_ref[row, base + q]           # pad_id -> all-zero row
                    pltpu.make_async_copy(
                        emb_hbm.at[pl.ds(tok, 1), :],
                        row_buf.at[slot, p, pl.ds(q, 1), :],
                        sem.at[slot],
                    ).start()

        def wait_tile(slot):
            # Single aggregate wait per seq tile (review #1): DMA semaphores count
            # bytes, and the TB*TS row copies issued on sem[slot] sum to exactly this
            # descriptor's size (TB*TS*Ep*4 bytes).
            pltpu.make_async_copy(row_buf.at[slot], row_buf.at[slot],
                                  sem.at[slot]).wait()

        # Prime slot 0, zero the accumulator.
        issue(0, 0)
        acc_ref[...] = jnp.zeros_like(acc_ref)

        @pl.loop(0, n_seq_tiles)
        def _(t):
            slot = t & 1
            wait_tile(slot)

            # Issue the next tile AFTER the wait so the descriptor pushes share a
            # basic block with the reduction below and the VLIW packer can hide them
            # under the VPU adds (review #3).
            @pl.when(t + 1 < n_seq_tiles)
            def _():
                issue(t + 1, 1 - slot)

            rows = row_buf[slot]                           # (TB, TS, Ep) f32
            acc_ref[...] += jnp.sum(rows, axis=1)          # pure adds in the hot loop

        # Finalize once per batch tile: mean scale, MXU matmul, bias, lane-dense store.
        pooled = acc_ref[...] * inv_s
        out_ref[...] = (jnp.dot(pooled, w_ref[...],
                                preferred_element_type=jnp.float32)
                        + b_ref[...])

    return kernel


# --------------------------------------------------------------------------------------
# Wrapper
# --------------------------------------------------------------------------------------
def text_classifier_forward(token_ids, embed_table, fc_w_t, fc_b, *,
                            tb=128, ts=64,
                            table_vmem_budget_bytes=16 * 1024 * 1024,
                            gather_scratch_budget_bytes=8 * 1024 * 1024,
                            vmem_limit_bytes=32 * 1024 * 1024,
                            force_hbm_gather=False):
    """token_ids: (B, S) int; embed_table: (V, E); fc_w_t: (E, C); fc_b: (C,)."""
    B, S = token_ids.shape
    V, E = embed_table.shape
    C = fc_w_t.shape[1]

    # ---- tiling / padding ------------------------------------------------------------
    # Batch tile: multiple of 8 sublanes, capped at the padded batch.  On v5e/v6e grow
    # `tb` toward the MXU height (128/256); on v7x keep >= 2 batch tiles in the grid so
    # ("parallel",) can split them across the two TensorCores.
    TB = min(_round_up(max(1, min(tb, B)), 8), _round_up(B, 8))
    if B > 16:                                   # keep >= 2 batch tiles (v7x megacore)
        TB = min(TB, _round_up(-(-B // 2), 8))
    Bp = _round_up(B, TB)
    nb = Bp // TB

    Ep = _round_up(E, 128)                       # lane-dense rows / adds
    Cp = _round_up(C, 128)                       # lane-dense (unmasked) output stores
    Vp = _round_up(V + 1, 8)                     # >= 1 extra all-zero row for padding
    pad_id = V                                   # pad tokens gather exact zeros

    ids = token_ids.astype(jnp.int32)
    table = jnp.zeros((Vp, Ep), jnp.float32).at[:V, :E].set(
        embed_table.astype(jnp.float32))
    w_pad = jnp.zeros((Ep, Cp), jnp.float32).at[:E, :C].set(
        fc_w_t.astype(jnp.float32))
    b_pad = jnp.zeros((1, Cp), jnp.float32).at[0, :C].set(fc_b.astype(jnp.float32))

    table_bytes = Vp * Ep * 4
    use_resident = (not force_hbm_gather) and (2 * table_bytes <= table_vmem_budget_bytes)

    if use_resident:
        # ------------- fast path: whole table resident in VMEM, no row DMAs ----------
        ids_pad = jnp.pad(ids, ((0, Bp - B), (0, 0)), constant_values=pad_id)
        kernel = _make_resident_kernel(S, TB, Ep, inner_unroll=min(8, S))
        in_specs = [
            pl.BlockSpec(memory_space=pltpu.MemorySpace.SMEM),   # token ids (scalars)
            pl.BlockSpec((Vp, Ep), lambda b: (0, 0)),            # table, VMEM-resident
            pl.BlockSpec((Ep, Cp), lambda b: (0, 0)),            # W^T (padded), resident
            pl.BlockSpec((1, Cp), lambda b: (0, 0)),             # bias (padded), resident
        ]
        operands = (ids_pad, table, w_pad, b_pad)
        scratch = [pltpu.VMEM((TB, Ep), jnp.float32)]            # pooled-sum accumulator
        bytes_accessed = table_bytes + Bp * S * 4 + Ep * Cp * 4 + Bp * Cp * 4
    else:
        # ------------- general path: HBM table + double-buffered row gather ----------
        TS = max(1, min(ts, S))
        # Fit the double-buffered gather scratch: shrink TS, not TB (v7x: 64 MiB VMEM).
        while TS > 8 and 2 * TB * TS * Ep * 4 > gather_scratch_budget_bytes:
            TS = (TS + 1) // 2
        n_seq = pl.cdiv(S, TS)                    # ragged tail -> pad-id columns
        Sp = n_seq * TS
        ids_pad = jnp.pad(ids, ((0, Bp - B), (0, Sp - S)), constant_values=pad_id)
        kernel = _make_gather_kernel(S, TB, TS, n_seq)
        in_specs = [
            pl.BlockSpec(memory_space=pltpu.MemorySpace.SMEM),   # token ids (scalars)
            pl.BlockSpec(memory_space=pl.ANY),                   # table stays in HBM
            pl.BlockSpec((Ep, Cp), lambda b: (0, 0)),            # W^T (padded), resident
            pl.BlockSpec((1, Cp), lambda b: (0, 0)),             # bias (padded), resident
        ]
        operands = (ids_pad, table, w_pad, b_pad)
        scratch = [
            pltpu.VMEM((2, TB, TS, Ep), jnp.float32),            # double-buffered rows
            pltpu.SemaphoreType.DMA((2,)),                       # one sem per slot
            pltpu.VMEM((TB, Ep), jnp.float32),                   # pooled-sum accumulator
        ]
        bytes_accessed = Bp * Sp * Ep * 4 + Bp * Sp * 4 + Ep * Cp * 4 + Bp * Cp * 4

    out = pl.pallas_call(
        kernel,
        out_shape=jax.ShapeDtypeStruct((Bp, Cp), jnp.float32),
        grid=(nb,),
        in_specs=in_specs,
        out_specs=pl.BlockSpec((TB, Cp), lambda b: (b, 0)),
        scratch_shapes=scratch,
        compiler_params=pltpu.CompilerParams(
            dimension_semantics=("parallel",),       # batch tiles -> 2 TCs on v7x
            vmem_limit_bytes=vmem_limit_bytes,       # raise toward ~100 MiB on v5e/v6e
        ),
        cost_estimate=pl.CostEstimate(
            flops=2 * Bp * Ep * Cp,
            transcendentals=0,
            bytes_accessed=bytes_accessed,
        ),
    )(*operands)

    return out[:B, :C]


def reference_forward(token_ids, embed_table, fc_w_t, fc_b):
    embedded = jnp.take(embed_table, token_ids, axis=0)   # (B, S, E)
    pooled = embedded.mean(axis=1)                        # (B, E)
    return pooled @ fc_w_t + fc_b                         # (B, C)


if __name__ == "__main__":
    # Small shapes consistent with the module: batch=2, seq=8, embed=32, classes=5,
    # vocab=50.
    B, S, E, C, V = 2, 8, 32, 5, 50

    key = jax.random.PRNGKey(0)
    k_ids, k_emb, k_w, k_b = jax.random.split(key, 4)

    token_ids = jax.random.randint(k_ids, (B, S), 0, V, dtype=jnp.int32)

    # Deterministic synthetic parameters (not a checkpoint).
    embed_table = jax.random.normal(k_emb, (V, E), dtype=jnp.float32)
    # nn.Linear(embed_dim, num_classes): weight (C, E), bias (C). Kernel takes W^T.
    bound = 1.0 / float(E) ** 0.5
    fc_w = jax.random.uniform(k_w, (C, E), minval=-bound, maxval=bound,
                              dtype=jnp.float32)
    fc_b = jax.random.uniform(k_b, (C,), minval=-bound, maxval=bound,
                              dtype=jnp.float32)
    fc_w_t = fc_w.T                                        # (E, C)

    ref = reference_forward(token_ids, embed_table, fc_w_t, fc_b)

    # Path 1: VMEM-resident table fast path (taken automatically at these shapes).
    out_fast = text_classifier_forward(token_ids, embed_table, fc_w_t, fc_b)
    out_fast = jax.block_until_ready(out_fast)
    assert out_fast.shape == (B, C)
    assert jnp.allclose(out_fast, ref, atol=1e-5, rtol=1e-5), (out_fast, ref)

    # Path 2: HBM-resident table + double-buffered row-gather DMAs. ts=3 gives
    # ceil(8/3)=3 seq tiles with a ragged tail, exercising the slot rotation, the
    # per-tile aggregate wait, and the pad-row tail handling.
    out_gather = text_classifier_forward(token_ids, embed_table, fc_w_t, fc_b,
                                         ts=3, force_hbm_gather=True)
    out_gather = jax.block_until_ready(out_gather)
    assert out_gather.shape == (B, C)
    assert jnp.allclose(out_gather, ref, atol=1e-5, rtol=1e-5), (out_gather, ref)

    print("KERNEL_OK")
</pallas_src>

<mosaic_0001>
module attributes {stable_mosaic.version = 11 : i64} {
  func.func @kernel(%arg0: i32, %arg1: memref<8x8xi32, #tpu.memory_space<smem>>, %arg2: memref<56x128xf32, #tpu.memory_space<vmem>>, %arg3: memref<128x128xf32, #tpu.memory_space<vmem>>, %arg4: memref<1x128xf32, #tpu.memory_space<vmem>>, %arg5: memref<8x128xf32, #tpu.memory_space<vmem>>, %arg6: memref<8x128xf32, #tpu.memory_space<vmem>>) attributes {dimension_semantics = [#tpu.dimension_semantics<parallel>], iteration_bounds = array<i64: 1>, scalar_prefetch = 0 : i64, scratch_operands = 1 : i64, tpu.core_type = #tpu.core_type<tc>, window_params = [{transform_indices = @transform_0, window_bounds = array<i64: 8, 8>}, {pipeline_mode = #tpu.pipeline_mode<synchronous>, transform_indices = @transform_1, window_bounds = array<i64: 56, 128>}, {pipeline_mode = #tpu.pipeline_mode<synchronous>, transform_indices = @transform_2, window_bounds = array<i64: 128, 128>}, {pipeline_mode = #tpu.pipeline_mode<synchronous>, transform_indices = @transform_3, window_bounds = array<i64: 1, 128>}, {transform_indices = @transform_4, window_bounds = array<i64: 8, 128>}]} {
    %c0_i32 = arith.constant 0 : i32
    %c8_i32 = arith.constant 8 : i32
    %0 = arith.addi %c0_i32, %c8_i32 : i32
    %c1_i32 = arith.constant 1 : i32
    scf.for %arg7 = %c0_i32 to %0 step %c1_i32  : i32 {
      %c1_i32_9 = arith.constant 1 : i32
      %10 = arith.muli %arg7, %c1_i32_9 : i32
      %c0_i32_10 = arith.constant 0 : i32
      %11 = arith.addi %c0_i32_10, %10 : i32
      %c8_i32_11 = arith.constant 8 : i32
      %12 = arith.muli %arg0, %c8_i32_11 : i32
      %13 = arith.addi %12, %11 : i32
      %cst_12 = arith.constant 0.000000e+00 : f32
      %14 = vector.broadcast %cst_12 : f32 to vector<1x128xf32>
      %c0_i32_13 = arith.constant 0 : i32
      %15 = arith.index_cast %13 : i32 to index
      %16 = arith.index_cast %c0_i32_13 : i32 to index
      %17 = memref.load %arg1[%15, %16] : memref<8x8xi32, #tpu.memory_space<smem>>
      %18 = arith.index_cast %17 : i32 to index
      %c0_14 = arith.constant 0 : index
      %19 = vector.load %arg2[%18, %c0_14] : memref<56x128xf32, #tpu.memory_space<vmem>>, vector<1x128xf32>
      %20 = arith.addf %14, %19 : vector<1x128xf32>
      %c1_i32_15 = arith.constant 1 : i32
      %21 = arith.index_cast %13 : i32 to index
      %22 = arith.index_cast %c1_i32_15 : i32 to index
      %23 = memref.load %arg1[%21, %22] : memref<8x8xi32, #tpu.memory_space<smem>>
      %24 = arith.index_cast %23 : i32 to index
      %c0_16 = arith.constant 0 : index
      %25 = vector.load %arg2[%24, %c0_16] : memref<56x128xf32, #tpu.memory_space<vmem>>, vector<1x128xf32>
      %26 = arith.addf %20, %25 : vector<1x128xf32>
      %c2_i32 = arith.constant 2 : i32
      %27 = arith.index_cast %13 : i32 to index
      %28 = arith.index_cast %c2_i32 : i32 to index
      %29 = memref.load %arg1[%27, %28] : memref<8x8xi32, #tpu.memory_space<smem>>
      %30 = arith.index_cast %29 : i32 to index
      %c0_17 = arith.constant 0 : index
      %31 = vector.load %arg2[%30, %c0_17] : memref<56x128xf32, #tpu.memory_space<vmem>>, vector<1x128xf32>
      %32 = arith.addf %26, %31 : vector<1x128xf32>
      %c3_i32 = arith.constant 3 : i32
      %33 = arith.index_cast %13 : i32 to index
      %34 = arith.index_cast %c3_i32 : i32 to index
      %35 = memref.load %arg1[%33, %34] : memref<8x8xi32, #tpu.memory_space<smem>>
      %36 = arith.index_cast %35 : i32 to index
      %c0_18 = arith.constant 0 : index
      %37 = vector.load %arg2[%36, %c0_18] : memref<56x128xf32, #tpu.memory_space<vmem>>, vector<1x128xf32>
      %38 = arith.addf %32, %37 : vector<1x128xf32>
      %c4_i32 = arith.constant 4 : i32
      %39 = arith.index_cast %13 : i32 to index
      %40 = arith.index_cast %c4_i32 : i32 to index
      %41 = memref.load %arg1[%39, %40] : memref<8x8xi32, #tpu.memory_space<smem>>
      %42 = arith.index_cast %41 : i32 to index
      %c0_19 = arith.constant 0 : index
      %43 = vector.load %arg2[%42, %c0_19] : memref<56x128xf32, #tpu.memory_space<vmem>>, vector<1x128xf32>
      %44 = arith.addf %38, %43 : vector<1x128xf32>
      %c5_i32 = arith.constant 5 : i32
      %45 = arith.index_cast %13 : i32 to index
      %46 = arith.index_cast %c5_i32 : i32 to index
      %47 = memref.load %arg1[%45, %46] : memref<8x8xi32, #tpu.memory_space<smem>>
      %48 = arith.index_cast %47 : i32 to index
      %c0_20 = arith.constant 0 : index
      %49 = vector.load %arg2[%48, %c0_20] : memref<56x128xf32, #tpu.memory_space<vmem>>, vector<1x128xf32>
      %50 = arith.addf %44, %49 : vector<1x128xf32>
      %c6_i32 = arith.constant 6 : i32
      %51 = arith.index_cast %13 : i32 to index
      %52 = arith.index_cast %c6_i32 : i32 to index
      %53 = memref.load %arg1[%51, %52] : memref<8x8xi32, #tpu.memory_space<smem>>
      %54 = arith.index_cast %53 : i32 to index
      %c0_21 = arith.constant 0 : index
      %55 = vector.load %arg2[%54, %c0_21] : memref<56x128xf32, #tpu.memory_space<vmem>>, vector<1x128xf32>
      %56 = arith.addf %50, %55 : vector<1x128xf32>
      %c7_i32 = arith.constant 7 : i32
      %57 = arith.index_cast %13 : i32 to index
      %58 = arith.index_cast %c7_i32 : i32 to index
      %59 = memref.load %arg1[%57, %58] : memref<8x8xi32, #tpu.memory_space<smem>>
      %60 = arith.index_cast %59 : i32 to index
      %c0_22 = arith.constant 0 : index
      %61 = vector.load %arg2[%60, %c0_22] : memref<56x128xf32, #tpu.memory_space<vmem>>, vector<1x128xf32>
      %62 = arith.addf %56, %61 : vector<1x128xf32>
      %c8_i32_23 = arith.constant 8 : i32
      %63 = arith.index_cast %11 : i32 to index
      %c0_24 = arith.constant 0 : index
      %64 = vector.load %arg6[%63, %c0_24] : memref<8x128xf32, #tpu.memory_space<vmem>>, vector<1x128xf32>
      tpu.vector_store %arg6[%63, %c0_24], %62 {strides = array<i32>} : memref<8x128xf32, #tpu.memory_space<vmem>>, vector<1x128xf32>,
    }
    %c8_i32_0 = arith.constant 8 : i32
    %c0 = arith.constant 0 : index
    %c0_1 = arith.constant 0 : index
    %1 = vector.load %arg6[%c0, %c0_1] : memref<8x128xf32, #tpu.memory_space<vmem>>, vector<8x128xf32>
    %cst = arith.constant 1.250000e-01 : f32
    %2 = vector.broadcast %cst : f32 to vector<8x128xf32>
    %3 = arith.mulf %1, %2 : vector<8x128xf32>
    %c0_2 = arith.constant 0 : index
    %c0_3 = arith.constant 0 : index
    %4 = vector.load %arg3[%c0_2, %c0_3] : memref<128x128xf32, #tpu.memory_space<vmem>>, vector<128x128xf32>
    %cst_4 = arith.constant dense<0.000000e+00> : vector<8x128xf32>
    %5 = tpu.matmul %3, %4, %cst_4 {dimension_numbers = #tpu.dot_dimension_numbers<[1], [0], [0], [1], [0, 0, 1, 1], [], []>} : vector<8x128xf32>, vector<128x128xf32>, vector<8x128xf32> -> vector<8x128xf32>
    %c0_5 = arith.constant 0 : index
    %c0_6 = arith.constant 0 : index
    %6 = vector.load %arg4[%c0_5, %c0_6] : memref<1x128xf32, #tpu.memory_space<vmem>>, vector<1x128xf32>
    %7 = vector.broadcast %6 : vector<1x128xf32> to vector<8x128xf32>
    %8 = arith.addf %5, %7 : vector<8x128xf32>
    %c0_7 = arith.constant 0 : index
    %c0_8 = arith.constant 0 : index
    %9 = vector.load %arg5[%c0_7, %c0_8] : memref<8x128xf32, #tpu.memory_space<vmem>>, vector<8x128xf32>
    tpu.vector_store %arg5[%c0_7, %c0_8], %8 {strides = array<i32>} : memref<8x128xf32, #tpu.memory_space<vmem>>, vector<8x128xf32>,
    return
  }
  func.func @transform_0(%arg0: i32) -> (i32, i32) {
    %c0_i32 = arith.constant 0 : i32
    %c0_i32_0 = arith.constant 0 : i32
    %c0_i32_1 = arith.constant 0 : i32
    return %c0_i32, %c0_i32_0 : i32, i32
  }
  func.func @transform_1(%arg0: i32) -> (i32, i32) {
    %c0_i32 = arith.constant 0 : i32
    %c0_i32_0 = arith.constant 0 : i32
    %c0_i32_1 = arith.constant 0 : i32
    return %c0_i32, %c0_i32_0 : i32, i32
  }
  func.func @transform_2(%arg0: i32) -> (i32, i32) {
    %c0_i32 = arith.constant 0 : i32
    %c0_i32_0 = arith.constant 0 : i32
    %c0_i32_1 = arith.constant 0 : i32
    return %c0_i32, %c0_i32_0 : i32, i32
  }
  func.func @transform_3(%arg0: i32) -> (i32, i32) {
    %c0_i32 = arith.constant 0 : i32
    %c0_i32_0 = arith.constant 0 : i32
    %c0_i32_1 = arith.constant 0 : i32
    return %c0_i32, %c0_i32_0 : i32, i32
  }
  func.func @transform_4(%arg0: i32) -> (i32, i32) {
    %c0_i32 = arith.constant 0 : i32
    %c0_i32_0 = arith.constant 0 : i32
    return %arg0, %c0_i32 : i32, i32
  }
}

</mosaic_0001>

<bundles_post_ra>
// kernel: tpu_custom_call.1
= control target key start
LH: loop header
LB: loop body
LE: loop exit
PB: predicated region body
PF: predicated region fallthrough
CT: control target
= control target key end

     0   :  { %9 = vsyncpa [#allocation6], 0  ;;  %s361_s0 = inlined_call_operand.hbm [shape: s32[8,8], index: 0, kind: input, shape index: {}]   ;;  %s362_s1 = inlined_call_operand.hbm [shape: f32[56,128], index: 1, kind: input, shape index: {}]   ;;  %s363_s2 = inlined_call_operand.hbm [shape: f32[128,128], index: 2, kind: input, shape index: {}]   ;;  %s364_s3 = inlined_call_operand.vmem [shape: f32[1,128], index: 3, kind: input, shape index: {}]   ;;  %s365_s4 = inlined_call_operand.hbm [shape: f32[8,128], index: 4, kind: output, shape index: {}]  }
   0x1   :  { %10 = vsyncpa [#allocation4], 0 }
   0x2   :  { %11 = vsyncpa [#allocation9], 0 }
   0x3   :  { %12 = vsyncpa [#allocation5], 0  ;;  %s18_s17 = sshll.u32 %s361_s0, 4  ;;  %s26_s20 = sshll.u32 %s362_s1, 4  ;;  %s19_s17 = int_to_ptr.hbm [resolvable:$true] %s18_s17  ;;  %s27_s20 = int_to_ptr.hbm [resolvable:$true] %s26_s20 }
   0x4   :  { %s305_s21 = smov [#allocation3]   ;;  %s306_s22 = smov [#allocation7]  }
   0x5   :  { %21 = dma.hbm_to_smem %s19_s17, 128, %s305_s21, [#allocation6]  }
   0x6   :  { %s28_s23 = sshll.u32 %s306_s22, 4  ;;  %s307_s24 = smov 128   ;;  %s29_s23 = int_to_ptr.vmem [resolvable:$true] %s28_s23 }
   0x7   :  { %s308_s25 = smov 8   ;;  %s39_s28 = sshll.u32 %s363_s2, 4  ;;  %s40_s28 = int_to_ptr.hbm [resolvable:$true] %s39_s28 }
   0x8   :  { %34 = dma.hbm_to_vmem [thread:$0]  %s27_s20, 896, %s29_s23, [#allocation4], %s307_s24, %s307_s24, %s308_s25  }
   0x9   :  { %s309_s0 = smov [#allocation8]  }
   0xa   :  { %s41_s29 = sshll.u32 %s309_s0, 4  ;;  %s42_s29 = int_to_ptr.vmem [resolvable:$true] %s41_s29 }
   0xb   :  { %47 = dma.hbm_to_vmem [thread:$0]  %s40_s28, 2048, %s42_s29, [#allocation9], %s307_s24, %s307_s24, %s308_s25  }
   0xc   :  { %293 = dma.done.wait [#allocation6], 128  }
   0xd   :  { %294 = vsyncadd [#allocation6], 4294967168 }
   0xe   :  { %295 = dma.done.wait [#allocation4], 896  }
   0xf   :  { %296 = vsyncadd [#allocation4], 4294966400 }
  0x10   :  { %297 = dma.done.wait [#allocation9], 2048  }
  0x11   :  { %298 = vsyncadd [#allocation9], 4294965248 }
  0x12   :  { %62 = sfence }
  0x13   :  { %s345_s1 = smov 0  }
  0x14 LB: > { %s189_s2 = sshll.u32 %s303_s1, 7  ;;  %s111_s27 = scalar_lea.vmem [#allocation2], %s303_s1  ;;  %s303_s1 = sphi %s345_s1, %s68_s1  }
  0x15   : > { %s72_s30 = sld [smem:[#allocation3 + %s189_s2]]  ;;  %s76_s5 = sadd.s32 1, %s189_s2 }
  0x16   : > { %s77_s6 = sld [smem:[#allocation3 + %s76_s5]]  ;;  %s81_s7 = sadd.s32 2, %s189_s2 }
  0x17   : > { %s82_s8 = sld [smem:[#allocation3 + %s81_s7]]  ;;  %s86_s9 = sadd.s32 3, %s189_s2 }
  0x18   : > { %s87_s10 = sld [smem:[#allocation3 + %s86_s9]]  ;;  %s91_s11 = sadd.s32 4, %s189_s2 }
  0x19   : > { %s92_s12 = sld [smem:[#allocation3 + %s91_s11]]  ;;  %s96_s13 = sadd.s32 5, %s189_s2 }
  0x1a   : > { %s97_s14 = sld [smem:[#allocation3 + %s96_s13]]  ;;  %s101_s15 = sadd.s32 6, %s189_s2 }
  0x1b   : > { %s102_s16 = sld [smem:[#allocation3 + %s101_s15]]  ;;  %s73_s17 = scalar_lea.vmem [#allocation7], %s72_s30 }
  0x1c   : > { %v74_v0 = vld [vmem:[%s73_s17] sm:$0x1]  ;;  %s106_s18 = sadd.s32 7, %s189_s2  ;;  %s78_s19 = scalar_lea.vmem [#allocation7], %s77_s6 }
  0x1d   : > { %v79_v1 = vld [vmem:[%s78_s19] sm:$0x1]  ;;  %s107_s20 = sld [smem:[#allocation3 + %s106_s18]]  ;;  %s83_s21 = scalar_lea.vmem [#allocation7], %s82_s8 }
  0x1e   : > { %v80_v2 = vadd.f32 %v79_v1, %v74_v0  ;;  %v84_v3 = vld [vmem:[%s83_s21] sm:$0x1]  ;;  %s88_s22 = scalar_lea.vmem [#allocation7], %s87_s10  ;;  %s68_s1 = sadd.s32 1, %s303_s1  }
  0x1f   : > { %v89_v4 = vld [vmem:[%s88_s22] sm:$0x1]  ;;  %s93_s23 = scalar_lea.vmem [#allocation7], %s92_s12  ;;  %p65_p0 = scmp.ge.s32.totalorder %s68_s1, 8  }
  0x20   : > { %v85_v5 = vadd.f32 %v84_v3, %v80_v2  ;;  %v94_v6 = vld [vmem:[%s93_s23] sm:$0x1]  ;;  %s98_s24 = scalar_lea.vmem [#allocation7], %s97_s14  ;;  %v130_v15 = vld [vmem:[#allocation8 + $0x78] sm:$0xff] (%p65_p0)  ;;  %v129_v16 = vld [vmem:[#allocation8 + $0x70] sm:$0xff] (%p65_p0)  ;;  %s310_s29 = smov (%p65_p0), [#allocation10]  }
  0x21   : > { %v99_v8 = vld [vmem:[%s98_s24] sm:$0x1]  ;;  %s103_s25 = scalar_lea.vmem [#allocation7], %s102_s16  ;;  %135 = vmatpush.msra.mxu0 (%p65_p0), %v130_v15  ;;  %v128_v17 = vld [vmem:[#allocation8 + $0x68] sm:$0xff] (%p65_p0)  ;;  %v126_v19 = vld [vmem:[#allocation8 + $0x58] sm:$0xff] (%p65_p0)  ;;  %s161_s1 = sshll.u32 (%p65_p0), %s310_s29, 4  ;;  %s162_s1 = int_to_ptr.vmem [resolvable:$true] %s161_s1 }
  0x22   : > { %v90_v7 = vadd.f32 %v89_v4, %v85_v5  ;;  %v104_v10 = vld [vmem:[%s103_s25] sm:$0x1]  ;;  %v125_v20 = vld [vmem:[#allocation8 + $0x50] sm:$0xff] (%p65_p0)  ;;  %v124_v21 = vld [vmem:[#allocation8 + $0x48] sm:$0xff] (%p65_p0)  ;;  %s163_s5 = sshll.u32 (%p65_p0), %s365_s4, 4  ;;  %s164_s5 = int_to_ptr.hbm [resolvable:$true] %s163_s5 }
  0x23   : > { %s108_s26 = scalar_lea.vmem [#allocation7], %s107_s20  ;;  %136 = vmatpush.msra.mxu0 (%p65_p0), %v129_v16  ;;  %v127_v18 = vld [vmem:[#allocation8 + $0x60] sm:$0xff] (%p65_p0)  ;;  %v122_v23 = vld [vmem:[#allocation8 + $0x38] sm:$0xff] (%p65_p0)  ;;  %v121_v24 = vld [vmem:[#allocation8 + $0x30] sm:$0xff] (%p65_p0) }
  0x24   : > { %v95_v9 = vadd.f32 %v94_v6, %v90_v7  ;;  %v109_v12 = vld [vmem:[%s108_s26] sm:$0x1]  ;;  %v120_v25 = vld [vmem:[#allocation8 + $0x28] sm:$0xff] (%p65_p0)  ;;  %v118_v27 = vld [vmem:[#allocation8 + $0x18] sm:$0xff] (%p65_p0) }
  0x25   :  { %137 = vmatpush.msra.mxu0 (%p65_p0), %v128_v17  ;;  %v123_v22 = vld [vmem:[#allocation8 + $0x40] sm:$0xff] (%p65_p0)  ;;  %v117_v28 = vld [vmem:[#allocation8 + $0x10] sm:$0xff] (%p65_p0)  ;;  %v116_v30 = vld [vmem:[#allocation8 + $0x8] sm:$0xff] (%p65_p0) }
  0x26   : > { %v100_v11 = vadd.f32 %v99_v8, %v95_v9  ;;  %v119_v26 = vld [vmem:[#allocation8 + $0x20] sm:$0xff] (%p65_p0) }
  0x27   :  { %138 = vmatpush.msra.mxu0 (%p65_p0), %v127_v18  ;;  %v115_v31 = vld [vmem:[#allocation8] sm:$0xff] (%p65_p0) }
  0x28   : > { %v105_v13 = vadd.f32 %v104_v10, %v100_v11  ;;  %67 = sbr.rel (!%p65_p0) target bundleno = 20 (0x14), region = 64  ;;  %v204_v33 = vld [vmem:[%s364_s3] ss:$0 sm:$0xff] (%p65_p0) }
  0x29   :  { %139 = vmatpush.msra.mxu0 (%p65_p0), %v126_v19 }
  0x2a   : > { %v110_v14 = vadd.f32 %v109_v12, %v105_v13 }
  0x2b   :  { %140 = vmatpush.msra.mxu0 (%p65_p0), %v125_v20 }
  0x2c   : > { %112 = vst [vmem:[%s111_s27] sm:$0x1] %v110_v14 }
  0x2d   :  { %141 = vmatpush.msra.mxu0 %v124_v21 }
  0x2f   :  { %142 = vmatpush.msra.mxu0 %v123_v22 }
  0x31   :  { %143 = vmatpush.msra.mxu0 %v122_v23 }
  0x33   :  { %144 = vmatpush.msra.mxu0 %v121_v24  ;;  %v113_v29 = vld [vmem:[#allocation2] sm:$0xff] }
  0x34   :  { %v114_v32 = vmul.f32 0.125, %v113_v29 }
  0x35   :  { %145 = vmatpush.msra.mxu0 %v120_v25 }
  0x37   :  { %146 = vmatpush.msra.mxu0 %v119_v26 }
  0x39   :  { %147 = vmatpush.msra.mxu0 %v118_v27 }
  0x3b   :  { %148 = vmatpush.msra.mxu0 %v117_v28 }
  0x3d   :  { %149 = vmatpush.msra.mxu0 %v116_v30 }
  0x3f   :  { %150 = vmatpush.msra.mxu0 %v115_v31 }
  0x40   :  { %151 = vmatmul.f32.vlgmr.msra.gmra.mxu0 %v114_v32 }
  0xbd   :  { %v152_v34 = vpop.f32.mrf.mxu0 }
  0xbe   :  { %v153_v35 = vadd.f32 %v204_v33, %v152_v34 }
  0xc0   :  { %155 = vst [vmem:[#allocation10] sm:$0xff] %v153_v35 }
  0xc1   :  { %166 = dma.vmem_to_hbm [thread:$0]  %s162_s1, 128, %s164_s5, [#allocation5]  }
  0xc2   :  { %299 = dma.done.wait [#allocation5], 128  }
  0xc3   :  { %300 = vsyncadd [#allocation5], 4294967168 }
  0xc4   :  { %171 = vsyncpa [#allocation4], 1 }
  0xc5   :  { %172 = vsyncpa [#allocation9], 1 }
  0xc6   :  { %173 = vsyncpa [#allocation5], 1 }
  0xc7   :  { %174 = vsyncpa [#allocation6], 1 }

</bundles_post_ra>
